<compile_context>
chip_gen: v6e
topology: v6e:2x2x1
jax: 0.10.0
libtpu: 0.0.40
codegen_flags: <defaults>
</compile_context>

<pallas_src>
import jax
import jax.numpy as jnp
from jax.experimental import pallas as pl
from jax.experimental.pallas import tpu as pltpu


_MIB = 1 << 20


# ----------------------------- hardware-aware sizing helpers -----------------------------

def _vmem_capacity_bytes() -> int:
    """Physical VMEM per TensorCore (128 MiB on v5e/v6e, 64 MiB on v7x)."""
    try:
        cap = int(pltpu.get_tpu_info().vmem_capacity_bytes)
        if cap > 0:
            return cap
    except Exception:
        pass
    return 64 * _MIB          # conservative fallback (v7x per-core VMEM)


def _vmem_limit_bytes(cap: int) -> int:
    # ~75% of physical: 96 MiB on v5e/v6e, 48 MiB on v7x — big enough for the large
    # streaming tiles, with headroom for compiler-internal scratch.
    return int(cap * 3 // 4)


def _pool_block_bytes(tb: int, ts: int, d: int, itemsize: int) -> int:
    hidden = 2 * tb * ts * d * itemsize        # streamed hidden tile, double-buffered
    mask = 2 * tb * ts * 4                     # int32 attention-mask tile
    plen = 2 * tb * 4
    out = 2 * tb * d * itemsize
    scratch = 8 * tb * d * 4 + 8 * tb * 4      # f32 accumulators (sublane-padded)
    return hidden + mask + plen + out + scratch


def _proj_block_bytes(b: int, d: int, tn: int, itemsize: int) -> int:
    weights = 2 * 2 * d * tn * itemsize        # W1 + W2 tiles, double-buffered
    resident = 2 * b * d * itemsize            # pooled reps
    biases = 2 * 2 * d * itemsize
    out = 2 * b * d * itemsize
    acc = b * d * 4
    return weights + resident + biases + out + acc


def _pick_batch_tile(b: int) -> int:
    # Keep the "parallel" batch grid axis at extent >= 2 whenever possible so both
    # TensorCores (v7x megacore) share the HBM-bound pooling stream.
    for tb in (8, 4, 2, 1):
        if b % tb == 0 and b // tb >= 2:
            return tb
    return b


def _pick_seq_tile(s: int, tb: int, d: int, itemsize: int, budget: int) -> int:
    # Multiples of 128 keep every block layout-aligned; pick the biggest tile that
    # fits the VMEM budget (measured: 128-wide ~29% of HBM roofline, 512-wide ~85%).
    cands = [t for t in (2048, 1024, 512, 256, 128) if t <= s and s % t == 0] or [s]
    for ts in cands:
        if _pool_block_bytes(tb, ts, d, itemsize) <= budget:
            return ts
    return cands[-1]


def _pick_hidden_tile(d: int, b: int, itemsize: int, budget: int) -> int:
    cands = [t for t in (1024, 512, 256, 128) if t <= d and d % t == 0] or [d]
    for tn in cands:
        if _proj_block_bytes(b, d, tn, itemsize) <= budget:
            return tn
    return cands[-1]


# ----------------------------- Kernel A: masked mean pooling -----------------------------

def pool_kernel(hs_ref, mask_ref, plen_ref, reps_ref, acc_ref, cnt_ref):
    s = pl.program_id(1)
    ts = hs_ref.shape[1]

    @pl.when(s == 0)
    def _init():
        acc_ref[...] = jnp.zeros_like(acc_ref)
        cnt_ref[...] = jnp.zeros_like(cnt_ref)

    mask = mask_ref[...]                                    # (TB, 1, TS) int32
    plen = plen_ref[...]                                    # (TB, 1, 1)  int32
    # prompt_length masking: attention_mask[i, :l] = 0  (global token position)
    pos = s * ts + jax.lax.broadcasted_iota(jnp.int32, mask.shape, 2)
    valid = (mask != 0) & (pos >= plen)                     # (TB, 1, TS) bool

    hs = hs_ref[...]                                        # (TB, TS, D) bf16 — kept bf16
    vf = valid.astype(hs.dtype)                             # 0/1 in bf16 — exact
    # MXU-offloaded masked sequence reduction: per batch row (1,TS) @ (TS,D) -> (1,D),
    # accumulated in f32.  Keeps the VPU / load slots free for the HBM stream.
    acc_ref[...] += jax.lax.dot_general(
        vf, hs,
        dimension_numbers=(((2,), (1,)), ((0,), (0,))),
        preferred_element_type=jnp.float32)                 # (TB, 1, D)
    cnt_ref[...] += jnp.sum(valid, axis=2, keepdims=True, dtype=jnp.float32)

    @pl.when(s == pl.num_programs(1) - 1)
    def _finalize():
        # PyTorch asserts mask.sum() > 0 per row; guard so a degenerate row gives 0, not NaN.
        denom = jnp.maximum(cnt_ref[...], 1.0)
        reps_ref[...] = (acc_ref[...] * pl.reciprocal(denom, approx=True)
                         ).astype(reps_ref.dtype)


# --------------------- Kernel B: Linear -> ReLU -> Linear (hidden-dim tiled) ---------------------

def mlp_kernel(reps_ref, w1_ref, b1_ref, w2_ref, b2_ref, proj_ref, acc_ref):
    j = pl.program_id(0)
    tn = w1_ref.shape[1]

    @pl.when(j == 0)
    def _init():
        acc_ref[...] = jnp.zeros_like(acc_ref)

    # b1 stays fully resident; slice the current hidden tile in-kernel (no tiny per-step DMA).
    off = pl.multiple_of(j * tn, tn)
    b1_tile = b1_ref[:, pl.ds(off, tn)]                    # (1, TN) bf16

    # Layer 1, column tile: (B, D) @ (D, TN) -> (B, TN), f32 MXU accumulation.
    h1 = jnp.dot(reps_ref[...], w1_ref[...], preferred_element_type=jnp.float32)
    # bf16 bias add + ReLU (matches torch bf16 nn.Linear semantics of the reference).
    h1 = jnp.maximum(h1.astype(proj_ref.dtype) + b1_tile, 0)
    # Layer 2, row tile: (B, TN) @ (TN, D) accumulated into f32 across hidden tiles.
    acc_ref[...] += jnp.dot(h1, w2_ref[...], preferred_element_type=jnp.float32)

    @pl.when(j == pl.num_programs(0) - 1)
    def _finalize():
        proj_ref[...] = acc_ref[...].astype(proj_ref.dtype) + b2_ref[...]


# ------------------------------------- wrappers -------------------------------------

def ullme_pool(hidden_state, attention_mask, prompt_length=None, *,
               seq_tile=None, batch_tile=None):
    """hidden_state: (B,S,D) bf16; attention_mask: (B,S) int; prompt_length: (B,) int or None."""
    B, S, D = hidden_state.shape
    cap = _vmem_capacity_bytes()
    vmem_limit = _vmem_limit_bytes(cap)
    budget = vmem_limit - 4 * _MIB

    TB = batch_tile if batch_tile is not None else _pick_batch_tile(B)
    TS = seq_tile if seq_tile is not None else _pick_seq_tile(
        S, TB, D, hidden_state.dtype.itemsize, budget)
    assert S % TS == 0 and B % TB == 0, "shapes must be divisible by tile sizes"

    if prompt_length is None:
        prompt_length = jnp.zeros((B,), jnp.int32)
    # 3-D carriers keep the batch tile out of the second-minor (sublane) position so any
    # TB is layout-legal, and present `valid` directly in the (TB,1,TS) matmul layout.
    mask3 = attention_mask.astype(jnp.int32).reshape(B, 1, S)
    plen3 = prompt_length.astype(jnp.int32).reshape(B, 1, 1)

    reps3 = pl.pallas_call(
        pool_kernel,
        out_shape=jax.ShapeDtypeStruct((B, 1, D), hidden_state.dtype),
        grid_spec=pltpu.PrefetchScalarGridSpec(
            num_scalar_prefetch=0,
            grid=(B // TB, S // TS),
            in_specs=[
                pl.BlockSpec((TB, TS, D), lambda b, s: (b, s, 0)),  # hidden-state stream
                pl.BlockSpec((TB, 1, TS), lambda b, s: (b, 0, s)),  # attention-mask stream
                pl.BlockSpec((TB, 1, 1),  lambda b, s: (b, 0, 0)),  # prompt_length, resident
            ],
            out_specs=pl.BlockSpec((TB, 1, D), lambda b, s: (b, 0, 0)),  # lane-dense
            scratch_shapes=[
                pltpu.VMEM((TB, 1, D), jnp.float32),   # masked-sum accumulator
                pltpu.VMEM((TB, 1, 1), jnp.float32),   # token-count accumulator
            ],
        ),
        compiler_params=pltpu.CompilerParams(
            dimension_semantics=("parallel", "arbitrary"),
            vmem_limit_bytes=vmem_limit),
    )(hidden_state, mask3, plen3)
    return reps3.reshape(B, D)


def ullme_projection(reps, w1t, b1, w2t, b2, *, hidden_tile=None):
    """reps: (B,D) bf16; w1t/w2t: (D,D) bf16 (pre-transposed); b1/b2: (D,) bf16."""
    B, D = reps.shape
    cap = _vmem_capacity_bytes()
    vmem_limit = _vmem_limit_bytes(cap)
    # Weight-bandwidth bound: give the weight tiles up to ~half of physical VMEM so TN
    # lands at 1024 on v5e/v6e and 512 on v7x for D=4096; shrinks automatically for big B.
    TN = hidden_tile if hidden_tile is not None else _pick_hidden_tile(
        D, B, reps.dtype.itemsize, cap // 2)
    assert D % TN == 0
    # TODO(synk): for very large contrastive batches the (B, D) reps/out/acc blocks should
    # also be tiled over B; left resident here since per-device B stays modest for ULLME.

    return pl.pallas_call(
        mlp_kernel,
        out_shape=jax.ShapeDtypeStruct((B, D), reps.dtype),
        grid_spec=pltpu.PrefetchScalarGridSpec(
            num_scalar_prefetch=0,
            grid=(D // TN,),
            in_specs=[
                pl.BlockSpec((B, D),  lambda j: (0, 0)),    # pooled reps, resident
                pl.BlockSpec((D, TN), lambda j: (0, j)),    # W1 column tile
                pl.BlockSpec((1, D),  lambda j: (0, 0)),    # b1, resident (sliced in-kernel)
                pl.BlockSpec((TN, D), lambda j: (j, 0)),    # W2 row tile
                pl.BlockSpec((1, D),  lambda j: (0, 0)),    # b2, resident
            ],
            out_specs=pl.BlockSpec((B, D), lambda j: (0, 0)),
            scratch_shapes=[pltpu.VMEM((B, D), jnp.float32)],
        ),
        compiler_params=pltpu.CompilerParams(
            dimension_semantics=("arbitrary",),
            vmem_limit_bytes=vmem_limit),
    )(reps, w1t, b1.reshape(1, D), w2t, b2.reshape(1, D))


def ullme_forward(hidden_state, attention_mask, prompt_length, w1t, b1, w2t, b2,
                  *, seq_tile=None, batch_tile=None, hidden_tile=None):
    reps = ullme_pool(hidden_state, attention_mask, prompt_length,
                      seq_tile=seq_tile, batch_tile=batch_tile)
    proj = ullme_projection(reps, w1t, b1, w2t, b2, hidden_tile=hidden_tile)
    return {"reps": reps, "projection": proj}


if __name__ == "__main__":
    B, S, D, V = 2, 256, 256, 64
    key = jax.random.PRNGKey(0)
    k1, k2, k3, k4, k5, k6 = jax.random.split(key, 6)

    # TODO(synk): the HuggingFace pretrained LLM backbone (+ LoRA/PEFT adapters) has no
    # self-contained Pallas equivalent; a deterministic embedding lookup stands in for
    # `self.model.model(...).hidden_states[-1]`.
    embed_table = jax.random.normal(k1, (V, D), jnp.float32) * 0.5
    input_ids = jax.random.randint(k2, (B, S), 0, V)
    attention_mask = jnp.concatenate(
        [jnp.ones((1, S), jnp.int32),
         jnp.concatenate([jnp.ones((1, 200), jnp.int32),
                          jnp.zeros((1, S - 200), jnp.int32)], axis=1)],
        axis=0)
    prompt_length = jnp.array([3, 5], dtype=jnp.int32)

    hidden_state = embed_table[input_ids].astype(jnp.bfloat16)   # (B, S, D)

    # output_projection params (model_dtype = bf16 because attn_implementation=='flash_attention_2')
    w1t = (jax.random.normal(k3, (D, D), jnp.float32) / jnp.sqrt(D)).astype(jnp.bfloat16)
    b1 = (jax.random.normal(k4, (D,), jnp.float32) * 0.01).astype(jnp.bfloat16)
    w2t = (jax.random.normal(k5, (D, D), jnp.float32) / jnp.sqrt(D)).astype(jnp.bfloat16)
    b2 = (jax.random.normal(k6, (D,), jnp.float32) * 0.01).astype(jnp.bfloat16)

    # Small tiles so the demo exercises multi-step accumulation on both grids and a
    # batch-parallel grid axis of extent 2 (default batch_tile picker gives TB=1 here).
    out = ullme_forward(hidden_state, attention_mask, prompt_length, w1t, b1, w2t, b2,
                        seq_tile=128, hidden_tile=128)
    jax.block_until_ready(out)

    # Pure-JAX reference check (same semantics as the PyTorch forward).
    mask = attention_mask.astype(jnp.float32)
    mask = mask * (jnp.arange(S)[None, :] >= prompt_length[:, None]).astype(jnp.float32)
    s = jnp.sum(hidden_state.astype(jnp.float32) * mask[:, :, None], axis=1)
    reps_ref = (s / jnp.sum(mask, axis=1, keepdims=True)).astype(jnp.bfloat16)
    h1 = jnp.maximum(
        jnp.dot(reps_ref, w1t, preferred_element_type=jnp.float32).astype(jnp.bfloat16) + b1, 0)
    proj_ref = jnp.dot(h1, w2t, preferred_element_type=jnp.float32).astype(jnp.bfloat16) + b2

    assert jnp.allclose(out["reps"].astype(jnp.float32), reps_ref.astype(jnp.float32),
                        atol=3e-2, rtol=3e-2)
    assert jnp.allclose(out["projection"].astype(jnp.float32), proj_ref.astype(jnp.float32),
                        atol=3e-2, rtol=3e-2)

    print("KERNEL_OK")
</pallas_src>

<mosaic_0001>
module attributes {stable_mosaic.version = 11 : i64} {
  func.func @pool_kernel(%arg0: i32, %arg1: i32, %arg2: memref<1x128x256xbf16, #tpu.memory_space<vmem>>, %arg3: memref<1x1x128xi32, #tpu.memory_space<vmem>>, %arg4: memref<1x1x1xi32, #tpu.memory_space<vmem>>, %arg5: memref<1x1x256xbf16, #tpu.memory_space<vmem>>, %arg6: memref<1x1x256xf32, #tpu.memory_space<vmem>>, %arg7: memref<1x1x1xf32, #tpu.memory_space<vmem>>) attributes {dimension_semantics = [#tpu.dimension_semantics<parallel>, #tpu.dimension_semantics<arbitrary>], iteration_bounds = array<i64: 2, 2>, scalar_prefetch = 0 : i64, scratch_operands = 2 : i64, tpu.core_type = #tpu.core_type<tc>, window_params = [{transform_indices = @transform_0, window_bounds = array<i64: 1, 128, 256>}, {transform_indices = @transform_1, window_bounds = array<i64: 1, 1, 128>}, {transform_indices = @transform_2, window_bounds = array<i64: 1, 1, 1>}, {transform_indices = @transform_3, window_bounds = array<i64: 1, 1, 256>}]} {
    %c0_i32 = arith.constant 0 : i32
    %0 = arith.cmpi eq, %arg1, %c0_i32 : i32
    %1 = arith.extui %0 : i1 to i32
    %c0_i32_0 = arith.constant 0 : i32
    %2 = arith.cmpi ne, %1, %c0_i32_0 : i32
    scf.if %2 {
      %cst_24 = arith.constant 0.000000e+00 : f32
      %32 = vector.broadcast %cst_24 : f32 to vector<1x1x256xf32>
      %c0_25 = arith.constant 0 : index
      %c0_26 = arith.constant 0 : index
      %c0_27 = arith.constant 0 : index
      %33 = vector.load %arg6[%c0_25, %c0_26, %c0_27] : memref<1x1x256xf32, #tpu.memory_space<vmem>>, vector<1x1x256xf32>
      tpu.vector_store %arg6[%c0_25, %c0_26, %c0_27], %32 {strides = array<i32>} : memref<1x1x256xf32, #tpu.memory_space<vmem>>, vector<1x1x256xf32>,
      %cst_28 = arith.constant 0.000000e+00 : f32
      %34 = vector.broadcast %cst_28 : f32 to vector<1x1x1xf32>
      %c0_29 = arith.constant 0 : index
      %c0_30 = arith.constant 0 : index
      %c0_31 = arith.constant 0 : index
      %35 = vector.load %arg7[%c0_29, %c0_30, %c0_31] : memref<1x1x1xf32, #tpu.memory_space<vmem>>, vector<1x1x1xf32>
      tpu.vector_store %arg7[%c0_29, %c0_30, %c0_31], %34 {strides = array<i32>} : memref<1x1x1xf32, #tpu.memory_space<vmem>>, vector<1x1x1xf32>,
    } else {
    }
    %c0 = arith.constant 0 : index
    %c0_1 = arith.constant 0 : index
    %c0_2 = arith.constant 0 : index
    %3 = vector.load %arg3[%c0, %c0_1, %c0_2] : memref<1x1x128xi32, #tpu.memory_space<vmem>>, vector<1x1x128xi32>
    %c0_3 = arith.constant 0 : index
    %c0_4 = arith.constant 0 : index
    %c0_5 = arith.constant 0 : index
    %4 = vector.load %arg4[%c0_3, %c0_4, %c0_5] : memref<1x1x1xi32, #tpu.memory_space<vmem>>, vector<1x1x1xi32>
    %c128_i32 = arith.constant 128 : i32
    %5 = arith.muli %arg1, %c128_i32 : i32
    %6 = tpu.iota {dimensions = array<i32: 2>} : vector<1x1x128xi32>
    %7 = vector.broadcast %5 : i32 to vector<1x1x128xi32>
    %8 = arith.addi %7, %6 : vector<1x1x128xi32>
    %c0_i32_6 = arith.constant 0 : i32
    %9 = vector.broadcast %c0_i32_6 : i32 to vector<1x1x128xi32>
    %10 = arith.cmpi ne, %3, %9 : vector<1x1x128xi32>
    %11 = vector.broadcast %4 : vector<1x1x1xi32> to vector<1x1x128xi32>
    %12 = arith.cmpi sge, %8, %11 : vector<1x1x128xi32>
    %13 = arith.andi %10, %12 : vector<1x1x128xi1>
    %c0_7 = arith.constant 0 : index
    %c0_8 = arith.constant 0 : index
    %c0_9 = arith.constant 0 : index
    %14 = vector.load %arg2[%c0_7, %c0_8, %c0_9] : memref<1x128x256xbf16, #tpu.memory_space<vmem>>, vector<1x128x256xbf16>
    %15 = arith.extui %13 : vector<1x1x128xi1> to vector<1x1x128xi32>
    %16 = arith.sitofp %15 : vector<1x1x128xi32> to vector<1x1x128xf32>
    %17 = arith.truncf %16 : vector<1x1x128xf32> to vector<1x1x128xbf16>
    %c0_10 = arith.constant 0 : index
    %c0_11 = arith.constant 0 : index
    %c0_12 = arith.constant 0 : index
    %18 = vector.load %arg6[%c0_10, %c0_11, %c0_12] : memref<1x1x256xf32, #tpu.memory_space<vmem>>, vector<1x1x256xf32>
    %cst = arith.constant dense<0.000000e+00> : vector<1x1x256xf32>
    %19 = tpu.matmul %17, %14, %cst {dimension_numbers = #tpu.dot_dimension_numbers<[2], [1], [1], [2], [0, 0, 0, 1, 1, 2], [0], [0]>} : vector<1x1x128xbf16>, vector<1x128x256xbf16>, vector<1x1x256xf32> -> vector<1x1x256xf32>
    %20 = arith.addf %18, %19 : vector<1x1x256xf32>
    %c0_13 = arith.constant 0 : index
    %c0_14 = arith.constant 0 : index
    %c0_15 = arith.constant 0 : index
    %21 = vector.load %arg6[%c0_13, %c0_14, %c0_15] : memref<1x1x256xf32, #tpu.memory_space<vmem>>, vector<1x1x256xf32>
    tpu.vector_store %arg6[%c0_13, %c0_14, %c0_15], %20 {strides = array<i32>} : memref<1x1x256xf32, #tpu.memory_space<vmem>>, vector<1x1x256xf32>,
    %c0_16 = arith.constant 0 : index
    %c0_17 = arith.constant 0 : index
    %c0_18 = arith.constant 0 : index
    %22 = vector.load %arg7[%c0_16, %c0_17, %c0_18] : memref<1x1x1xf32, #tpu.memory_space<vmem>>, vector<1x1x1xf32>
    %23 = arith.extui %13 : vector<1x1x128xi1> to vector<1x1x128xi32>
    %24 = arith.sitofp %23 : vector<1x1x128xi32> to vector<1x1x128xf32>
    %cst_19 = arith.constant dense<0.000000e+00> : vector<1x1xf32>
    %25 = vector.multi_reduction <add>, %24, %cst_19 [2] : vector<1x1x128xf32> to vector<1x1xf32>
    %26 = vector.shape_cast %25 : vector<1x1xf32> to vector<1x1x1xf32>
    %27 = arith.addf %22, %26 : vector<1x1x1xf32>
    %c0_20 = arith.constant 0 : index
    %c0_21 = arith.constant 0 : index
    %c0_22 = arith.constant 0 : index
    %28 = vector.load %arg7[%c0_20, %c0_21, %c0_22] : memref<1x1x1xf32, #tpu.memory_space<vmem>>, vector<1x1x1xf32>
    tpu.vector_store %arg7[%c0_20, %c0_21, %c0_22], %27 {strides = array<i32>} : memref<1x1x1xf32, #tpu.memory_space<vmem>>, vector<1x1x1xf32>,
    %c1_i32 = arith.constant 1 : i32
    %29 = arith.cmpi eq, %arg1, %c1_i32 : i32
    %30 = arith.extui %29 : i1 to i32
    %c0_i32_23 = arith.constant 0 : i32
    %31 = arith.cmpi ne, %30, %c0_i32_23 : i32
    scf.if %31 {
      %c0_24 = arith.constant 0 : index
      %c0_25 = arith.constant 0 : index
      %c0_26 = arith.constant 0 : index
      %32 = vector.load %arg7[%c0_24, %c0_25, %c0_26] : memref<1x1x1xf32, #tpu.memory_space<vmem>>, vector<1x1x1xf32>
      %cst_27 = arith.constant 1.000000e+00 : f32
      %33 = vector.broadcast %cst_27 : f32 to vector<1x1x1xf32>
      %34 = arith.maximumf %32, %33 : vector<1x1x1xf32>
      %c0_28 = arith.constant 0 : index
      %c0_29 = arith.constant 0 : index
      %c0_30 = arith.constant 0 : index
      %35 = vector.load %arg6[%c0_28, %c0_29, %c0_30] : memref<1x1x256xf32, #tpu.memory_space<vmem>>, vector<1x1x256xf32>
      %36 = tpu.reciprocal %34 {approx = true} : vector<1x1x1xf32> -> vector<1x1x1xf32>
      %37 = vector.broadcast %36 : vector<1x1x1xf32> to vector<1x1x256xf32>
      %38 = arith.mulf %35, %37 : vector<1x1x256xf32>
      %39 = arith.truncf %38 : vector<1x1x256xf32> to vector<1x1x256xbf16>
      %c0_31 = arith.constant 0 : index
      %c0_32 = arith.constant 0 : index
      %c0_33 = arith.constant 0 : index
      %40 = vector.load %arg5[%c0_31, %c0_32, %c0_33] : memref<1x1x256xbf16, #tpu.memory_space<vmem>>, vector<1x1x256xbf16>
      tpu.vector_store %arg5[%c0_31, %c0_32, %c0_33], %39 {strides = array<i32>} : memref<1x1x256xbf16, #tpu.memory_space<vmem>>, vector<1x1x256xbf16>,
    } else {
    }
    return
  }
  func.func @transform_0(%arg0: i32, %arg1: i32) -> (i32, i32, i32) {
    %c0_i32 = arith.constant 0 : i32
    %c0_i32_0 = arith.constant 0 : i32
    return %arg0, %arg1, %c0_i32 : i32, i32, i32
  }
  func.func @transform_1(%arg0: i32, %arg1: i32) -> (i32, i32, i32) {
    %c0_i32 = arith.constant 0 : i32
    %c0_i32_0 = arith.constant 0 : i32
    return %arg0, %c0_i32, %arg1 : i32, i32, i32
  }
  func.func @transform_2(%arg0: i32, %arg1: i32) -> (i32, i32, i32) {
    %c0_i32 = arith.constant 0 : i32
    %c0_i32_0 = arith.constant 0 : i32
    %c0_i32_1 = arith.constant 0 : i32
    return %arg0, %c0_i32, %c0_i32_0 : i32, i32, i32
  }
  func.func @transform_3(%arg0: i32, %arg1: i32) -> (i32, i32, i32) {
    %c0_i32 = arith.constant 0 : i32
    %c0_i32_0 = arith.constant 0 : i32
    %c0_i32_1 = arith.constant 0 : i32
    return %arg0, %c0_i32, %c0_i32_0 : i32, i32, i32
  }
}

</mosaic_0001>

<bundles_post_ra>
// kernel: tpu_custom_call.1
= control target key start
LH: loop header
LB: loop body
LE: loop exit
PB: predicated region body
PF: predicated region fallthrough
CT: control target
= control target key end

     0   :  { %8 = vsyncpa [#allocation5], 0  ;;  %s1050_s0 = inlined_call_operand.hbm [shape: bf16[2,256,256], index: 0, kind: input, shape index: {}]   ;;  %s1051_s1 = inlined_call_operand.vmem [shape: s32[2,1,256], index: 1, kind: input, shape index: {}]   ;;  %s1052_s2 = inlined_call_operand.vmem [shape: s32[2,1,1], index: 2, kind: input, shape index: {}]   ;;  %s1053_s3 = inlined_call_operand.vmem [shape: bf16[2,1,256], index: 3, kind: output, shape index: {}]  }
   0x1   :  { %10 = vsyncpa [#allocation5 + $0x1], 0  ;;  %s884_s12 = smov 0   ;;  %s886_s13 = smov 0  }
   0x2   :  { %s888_s14 = smov 0   ;;  %s890_s15 = smov 0  }
   0x3   :  { %s892_s16 = smov 0   ;;  %s894_s17 = smov 0  }
   0x4   :  { %s896_s18 = smov 0   ;;  %s898_s19 = smov 0  }
   0x5 LB: > { %s613_s20 = sadd.s32 4294967295, %s853_s19   ;;  %s25_s21 = sadd.s32 1, %s845_s17  ;;  %s853_s19 = sphi %s898_s19, %s16_s19   ;;  %s849_s18 = sphi %s896_s18, %s1063_s18   ;;  %s845_s17 = sphi %s894_s17, %s1062_s17   ;;  %s841_s16 = sphi %s892_s16, %s1061_s16   ;;  %s837_s15 = sphi %s890_s15, %s1060_s15   ;;  %s833_s14 = sphi %s888_s14, %s1059_s14   ;;  %s829_s13 = sphi %s886_s13, %s1058_s13   ;;  %s825_s12 = sphi %s884_s12, %s1057_s12  }
   0x6   : > { %p26_p0 = scmp.ge.s32.totalorder %s25_s21, 2  ;;  %s28_s22 = sadd.s32 1, %s849_s18 }
   0x7   : > { %s37_s23 = sadd.s32 1, %s833_s14  ;;  %p44_p1 = scmp.ne.s32.totalorder %s833_s14, %s829_s13 }
   0x8   : > { %s1065_s21 = smov (%p26_p0, %s25_s21), 0  ;;  %s1067_s22 = smov (!%p26_p0, %s28_s22), %s849_s18 }
   0x9   : > { %s33_s24 = ssub.s32 %s845_s17, %s1065_s21  ;;  %p45_p2 = scmp.eq.s32.totalorder %s853_s19, 0 }
   0xa   : > { %p30_p3 = scmp.ge.s32.totalorder %s1067_s22, 2  ;;  %p50_p4 = scmp.ne.s32.totalorder %s829_s13, %s825_s12 }
   0xb   : > { %p935_p5 = por %p45_p2, %p44_p1  ;;  %p51_p6 = scmp.eq.s32.totalorder %s613_s20, 0 }
   0xc   : > { %s1069_s22 = smov (%p30_p3, %s1067_s22), 0  ;;  %p658_p8 = scmp.lt.s32.totalorder %s853_s19, 4 }
   0xd   : > { %p941_p7 = por %p51_p6, %p50_p4  ;;  %s32_s27 = ssub.s32 %s849_s18, %s1069_s22 }
   0xe   : > { %s34_s28 = sor.u32 %s33_s24, %s32_s27  ;;  %s154_s29 = sand.u32 1, %s833_s14  }
   0xf   : > { %p35_p9 = scmp.eq.s32.totalorder %s34_s28, 0  ;;  %s617_s30 = sshll.u32 %s154_s29, 7 }
  0x10   : > { %s651_s4 = sshll.u32 %s845_s17, 5  ;;  %s620_s6 = sshll.u32 %s849_s18, 6 }
  0x11   : > { %s951_s5 = scalar_select %p35_p9, %s833_s14, %s37_s23  }
  0x12   : > { %s165_s7 = sadd.s32 %s651_s4, %s620_s6  ;;  %s158_s8 = scalar_lea.vmem [#allocation4], %s617_s30 }
  0x13   : > { %s168_s9 = sshll.u32 %s158_s8, 4  ;;  %s621_s10 = sshll.u32 %s165_s7, 6  ;;  %s169_s9 = int_to_ptr.vmem [resolvable:$true] %s168_s9 }
  0x14   : > { %s167_s20 = scalar_lea.hbm %s1050_s0, %s621_s10  ;;  %p961_p10 = pnand %p658_p8, %p935_p5 }
  0x15   : > { %p622_p11 = scmp.ge.s32.totalorder %s853_s19, 1  ;;  %s155_s23 = scalar_lea.sflag [#allocation5], %s154_s29 }
  0x16   : > { %p761_p12 = pneg %p961_p10  ;;  %s772_s27 = scalar_lea.vmem %s169_s9, 2048 }
  0x17   : > { %p773_p13 = scmp.ne.s32.totalorder %s169_s9, %s772_s27  ;;  %s855_s28 = smov [#allocation4]  }
  0x18   : > { %s777_s30 = sshll.u32 %s855_s28, 4  ;;  %s778_s30 = int_to_ptr.vmem [resolvable:$false] %s777_s30 }
  0x19   : > { %p775_p0 = pnand %p773_p13, %p761_p12  ;;  %s779_s4 = scalar_lea.vmem %s778_s30, 4096 }
  0x1a   : > { %p780_p2 = scmp.lt.s32.totalorder %s169_s9, %s778_s30  ;;  %p781_p3 = scmp.lt.s32.totalorder %s779_s4, %s772_s27 }
  0x1b   : > { %p776_p1 = pneg %p775_p0 }
  0x1c   : > { %p782_p4 = por %p781_p3, %p780_p2 }
  0x1e   : > { %p783_p5 = pnand %p782_p4, %p776_p1 }
  0x20   : > { %786 = shalt.err (!%p783_p5)
}
  0x21   : > { %s856_s25 = smov 128   ;;  %s857_s29 = smov 8  }
  0x22   : > { %657 = dma.hbm_to_vmem [thread:$0]  (!%p961_p10), %s167_s20, 2048, %s169_s9, %s155_s23, %s856_s25, %s856_s25, %s857_s29  }
  0x23   : > { %p192_p6 = scmp.lt.s32.totalorder %s853_s19, 5 }
  0x25   : > { %p193_p8 = pnand %p622_p11, %p192_p6 }
  0x26   : > { %s198_s6 = sand.u32 (!%p193_p8), 1, %s829_s13  }
  0x27   : > { %196 = sbr.rel (%p193_p8) target bundleno = 550 (0x226), region = 32  ;;  %s623_s7 = sshll.u32 (!%p193_p8), %s198_s6, 7 }
  0x28   : > { %s199_s8 = scalar_lea.sflag (!%p193_p8), [#allocation5], %s198_s6  ;;  %s974_s10 = scalar_lea.vmem (!%p193_p8), [#allocation4], %s623_s7 }
  0x2c   : > { %820 = dma.done.wait (%p941_p7), %s199_s8, 2048  }
  0x2d   : > { %822 = vsyncadd (%p941_p7), %s199_s8, 4294965248  ;;  %p235_p9 = scmp.lt.s32.totalorder %s841_s16, 1  ;;  %p237_p10 = scmp.lt.s32.totalorder %s837_s15, 1 }
  0x2e   : > { %p626_p7 = scmp.ne.s32.totalorder %s837_s15, 0 }
  0x2f   : > { %s1071_s16 = smov (!%p235_p9, %s841_s16), 1 }
  0x30   : > { %s238_s9 = scalar_select %p237_p10, %s837_s15, 1 }
  0x31   : > { %s624_s11 = sshll.u32 %s1071_s16, 1  ;;  %s244_s24 = scalar_lea.vmem %s1052_s2, %s1071_s16 }
  0x32   : > { %s987_s23 = sadd.s32 %s624_s11, %s238_s9  ;;  %s992_s26 = scalar_lea.vmem %s1053_s3, %s624_s11 }
  0x33   : > { %s241_s25 = scalar_lea.vmem %s1051_s1, %s987_s23  ;;  %253 = sbr.rel (%p626_p7) target bundleno = 60 (0x3c), region = 40 }
  0x38   : > { %v254_v0 = vlaneseq  ;;  %vm259_vm0 = vcmask 0   ;;  %v858_v1 = vmov 0.0  }
  0x39   : > { %260 = vst.msk [vmem:[#allocation3] sm:$0x1] %vm259_vm0, %v858_v1 }
  0x3a   : > { %vm256_vm1 = vcmp.lt.s32.totalorder %v254_v0, 256 }
  0x3b   : > { %258 = vst.msk [vmem:[#allocation2] sm:$0x3] %vm256_vm1, %v858_v1 }
  0x3c PF: > { %v262_v2 = vld [vmem:[%s244_s24] sm:$0x1]  ;;  %v859_v3 = vmov 0   ;;  %v734_v5 = vld [vmem:[%s974_s10 + $0x70] ss:$8 sps:$4 sm:$0xff]   ;;  %v264_v20 = vlaneseq  ;;  %s627_s16 = sshll.u32 %s837_s15, 7 }
  0x3d   : > { %731 = vset.pattern.permute.xlu0 %v859_v3  ;;  %v732_v4 = vld [vmem:[%s974_s10 + $0x74] ss:$8 sps:$4 sm:$0xff]   ;;  %410 = vmatprep.mubr.bf16.mxu0 %v859_v3  ;;  %v735_v6 = vld [vmem:[%s974_s10 + $0x64] ss:$8 sps:$4 sm:$0xff]   ;;  %v737_v7 = vld [vmem:[%s974_s10 + $0x60] ss:$8 sps:$4 sm:$0xff]   ;;  %v266_v23 = vstv %s627_s16 }
  0x3e   : > { %270 = vperm.xlu0 %731, %v262_v2   ;;  %378 = vmatprep.subr.bf16.mxu0 %v732_v4  ;;  %v738_v8 = vld [vmem:[%s974_s10 + $0x54] ss:$8 sps:$4 sm:$0xff]   ;;  %v740_v9 = vld [vmem:[%s974_s10 + $0x50] ss:$8 sps:$4 sm:$0xff]   ;;  %v741_v10 = vld [vmem:[%s974_s10 + $0x44] ss:$8 sps:$4 sm:$0xff]  }
  0x3f   : > { %379 = vmatpush1.bf16.msra.mxu0 %v734_v5  ;;  %v743_v11 = vld [vmem:[%s974_s10 + $0x40] ss:$8 sps:$4 sm:$0xff]   ;;  %v744_v12 = vld [vmem:[%s974_s10 + $0x34] ss:$8 sps:$4 sm:$0xff]   ;;  %v746_v13 = vld [vmem:[%s974_s10 + $0x30] ss:$8 sps:$4 sm:$0xff]  }
  0x40   : > { %380 = vmatprep.subr.bf16.mxu0 %v735_v6  ;;  %v747_v14 = vld [vmem:[%s974_s10 + $0x24] ss:$8 sps:$4 sm:$0xff]   ;;  %v749_v15 = vld [vmem:[%s974_s10 + $0x20] ss:$8 sps:$4 sm:$0xff]   ;;  %v750_v16 = vld [vmem:[%s974_s10 + $0x14] ss:$8 sps:$4 sm:$0xff]  }
  0x41   : > { %v752_v17 = vld [vmem:[%s974_s10 + $0x10] ss:$8 sps:$4 sm:$0xff]   ;;  %v753_v18 = vld [vmem:[%s974_s10 + $0x4] ss:$8 sps:$4 sm:$0xff]   ;;  %v755_v19 = vld [vmem:[%s974_s10] ss:$8 sps:$4 sm:$0xff]  }
  0x42   : > { %v273_v21 = vshrl.u32 %v264_v20, 7  ;;  %v265_v22 = vand.u32 127, %v264_v20  ;;  %v261_v25 = vld [vmem:[%s241_s25] sm:$0x1]  ;;  %vm444_vm4 = vcmask 1040384   ;;  %v860_v29 = vmov 0.0  }
  0x43   : > { %381 = vmatpush1.bf16.msra.mxu0 %v737_v7  ;;  %vm268_vm2 = vcmp.ne.s32.totalorder %v261_v25, 0  ;;  %v861_v31 = vmov 1.0|1.0   ;;  %v443_v33 = vld [vmem:[#allocation3] sm:$0x1]  ;;  %vm449_vm7 = vcmask 0  }
  0x44   : > { %382 = vmatprep.subr.bf16.mxu0 %v738_v8  ;;  %v274_v24 = vsub.s32 0, %v273_v21  ;;  %v267_v26 = vadd.s32 %v266_v23, %v265_v22  ;;  %v862_v36 = vmov 1966171168   ;;  %v297_v45 = vld [vmem:[#allocation2] sm:$0x3]  ;;  %vm440_vm8 = vcmp.lt.s32.totalorder %v264_v20, 256 }
  0x45   : > { %v423_v37 = vunpack.c.l.s4 %v862_v36  ;;  %p647_p11 = scmp.ne.s32.totalorder %s837_s15, 1 }
  0x47   : > { %383 = vmatpush1.bf16.msra.mxu0 %v740_v9  ;;  %v424_v38 = vunpack.c.0.s8 %v423_v37 }
  0x48   : > { %384 = vmatprep.subr.bf16.mxu0 %v741_v10 }
  0x49   : > { %v427_v40 = vsub.s32 %v424_v38, %v273_v21 }
  0x4b   : > { %385 = vmatpush1.bf16.msra.mxu0 %v743_v11 }
  0x4c   : > { %386 = vmatprep.subr.bf16.mxu0 %v744_v12 }
  0x4f   : > { %387 = vmatpush1.bf16.msra.mxu0 %v746_v13 }
  0x50   : > { %388 = vmatprep.subr.bf16.mxu0 %v747_v14 }
  0x53   : > { %389 = vmatpush1.bf16.msra.mxu0 %v749_v15 }
  0x54   : > { %390 = vmatprep.subr.bf16.mxu0 %v750_v16 }
  0x57   : > { %391 = vmatpush1.bf16.msra.mxu0 %v752_v17 }
  0x58   : > { %392 = vmatprep.subr.bf16.mxu0 %v753_v18 }
  0x5b   : > { %393 = vmatpush1.bf16.msra.mxu0 %v755_v19 }
  0xb9   : > { %v271_v27 = vpop.permute.xlu0 %270 }
  0xba   : > { %v275_v28 = vrot.slane %v271_v27, %v274_v24 }
  0xbc   : > { %vm276_vm3 = vcmp.ge.s32.totalorder %v267_v26, %v275_v28 }
  0xbd   : > { %vm277_vm5 = vmand %vm268_vm2, %vm276_vm3 }
  0xbe   : > { %vm645_vm6 = vmpackc.low %vm277_vm5, %vm277_vm5  ;;  %v628_v30 = vsel %vm277_vm5, 1.0, %v860_v29 }
  0xbf   : > { %646 = vmatmul.mubr.msk.bf16.vlgmr.msra.gmra.mxu0 %vm645_vm6, %v861_v31  ;;  %v445_v32 = vsel %vm444_vm4, %v628_v30, 0.0 }
  0xc0   : > { %446 = vadd.xlane.f32.xlu0 %v445_v32 }
 0x149   : > { %v447_v34 = vpop.xlane.xlu0 %446 }
 0x14a   : > { %v448_v35 = vadd.f32 %v447_v34, %v443_v33 }
 0x14c   : > { %450 = vst.msk [vmem:[#allocation3] sm:$0x1] %vm449_vm7, %v448_v35 }
 0x17f   : > { %v412_v39 = vpop.f32.mrf.mxu0 }
 0x181   : > { %v414_v41 = vpop.f32.mrf.mxu0 }
 0x182   : > { %v421_v42 = vcombine.low %v412_v39, %v414_v41 }
 0x183   : > { %v416_v43 = vpop.f32.mrf.mxu0 }
 0x184   : > { %v428_v44 = vrot.slane %v421_v42, %v427_v40 }
 0x185   : > { %v417_v46 = vpop.f32.mrf.mxu0 }
 0x186   : > { %v435_v47 = vrot.slane %v428_v44, %v427_v40  ;;  %454 = sbr.rel (%p647_p11) target bundleno = 550 (0x226), region = 44 }
 0x188   : > { %v437_v48 = vadd.f32 %v435_v47, %v297_v45 }
 0x18a   : > { %442 = vst.msk [vmem:[#allocation2] sm:$0x3] %vm440_vm8, %v437_v48 }
 0x18b   : > { %v455_v49 = vld [vmem:[#allocation3] sm:$0x1]  ;;  %v863_v50 = vmov 0   ;;  %v476_v55 = vsub.s32 1, %v273_v21  ;;  %vm501_vm9 = vsmask.f32 256 }
 0x18c   : > { %756 = vset.pattern.permute.xlu0 %v863_v50  ;;  %v456_v51 = vmax.f32 %v455_v49, 1.0  ;;  %vm503_vm10 = vcmask 1041409   ;;  %vm504_vm11 = vsmask.f32 1280  ;;  %vm502_vm12 = vmand %vm444_vm4, %vm501_vm9  ;;  %v507_v62 = vld [vmem:[%s992_s26] sm:$0x3] }
 0x18d   : > { %vm505_vm13 = vmand %vm503_vm10, %vm504_vm11 }
 0x18e   : > { %757 = vrcp.f32 %v456_v51  ;;  %vm506_vm14 = vmor %vm505_vm13, %vm502_vm12 }
 0x191   : > { %v457_v53 = vld [vmem:[#allocation2] sm:$0x3] }
 0x19b   : > { %v758_v52 = vpop.eup %757 }
 0x19c   : > { %461 = vperm.xlu0 %756, %v758_v52  }
 0x217   : > { %v462_v54 = vpop.permute.xlu0 %461 }
 0x218   : > { %v467_v56 = vrot.slane %v462_v54, %v274_v24 }
 0x21a   : > { %v468_v57 = vmul.f32 %v467_v56, %v457_v53 }
 0x21c   : > { %v473_v58 = vrot.slane %v468_v57, %v274_v24  ;;  %v477_v59 = vrot.slane %v468_v57, %v476_v55 }
 0x21e   : > { %v648_v60 = vpack.c.bf16 %v477_v59, %v473_v58 }
 0x220   : > { %v491_v61 = vrot.slane %v648_v60, %v427_v40 }
 0x222   : > { %v498_v63 = vrot.slane %v491_v61, %v427_v40 }
 0x224   : > { %v508_v0 = vsel %vm506_vm14, %v498_v63, %v507_v62 }
 0x225   : > { %509 = vst [vmem:[%s992_s26] sm:$0x3] %v508_v0 }
 0x226 PF: > { %s16_s19 = sadd.s32 1, %s853_s19   ;;  %s1057_s12 = smov %s829_s13 }
 0x227   : > { %p13_p12 = scmp.ge.s32.totalorder %s16_s19, 6   ;;  %s1058_s13 = smov %s833_s14 }
 0x228   : > { %s1059_s14 = smov %s951_s5  ;;  %s1060_s15 = smov %s845_s17 }
 0x229   : > { %s1061_s16 = smov %s849_s18  ;;  %s1062_s17 = smov %s1065_s21 }
 0x22a   : > { %s1063_s18 = smov %s1069_s22  ;;  %15 = sbr.rel (!%p13_p12) target bundleno = 5 (0x5), region = 86 }
 0x22f   :  { %529 = vsyncpa [#allocation5], 1 }
 0x230   :  { %531 = vsyncpa [#allocation5 + $0x1], 1 }

</bundles_post_ra>
